<compile_context>
chip_gen: v7x
topology: tpu7x:2x2x1
jax: 0.10.0
libtpu: 0.0.40
codegen_flags: <defaults>
</compile_context>

<pallas_src>
import jax
import jax.numpy as jnp
from jax.experimental import pallas as pl
from jax.experimental.pallas import tpu as pltpu


def _dropout_t_kernel(keep_ref, x_ref, o_ref):
    """Training tile body.

    keep_ref: (1, tm)  per-column keep mask already fused with 1/(1-p)
    x_ref:    (tn, tm) tile of x
    o_ref:    (tm, tn) tile of the transposed output
    """
    y = x_ref[...] * keep_ref[...]            # broadcast multiply (VPU)
    o_ref[...] = jnp.transpose(y, (1, 0))     # XLU transpose -> lane-dense store


def _transpose_kernel(x_ref, o_ref):
    """Eval tile body: pure tiled transpose (no PRNG / mask / multiply)."""
    o_ref[...] = jnp.transpose(x_ref[...], (1, 0))


def _pick_tiles(n, m, block_rows, block_cols):
    # Full extent when an axis already fits one block (always a legal block
    # shape); otherwise a fixed, VMEM-bounded tile with cdiv edge blocks.
    tn = n if n <= block_rows else block_rows
    tm = m if m <= block_cols else block_cols
    # v7x has 2 TensorCores: if the grid collapsed to (1, 1), split one axis
    # in half when the half still satisfies the (8, 128) layout constraints
    # for BOTH the x tile (tn sublane / tm lane) and the transposed output
    # tile (tm sublane / tn lane).
    if pl.cdiv(n, tn) == 1 and pl.cdiv(m, tm) == 1:
        if tn % 256 == 0:          # tn/2 stays a multiple of 128
            tn //= 2
        elif tm % 256 == 0:        # tm/2 stays a multiple of 128
            tm //= 2
    return tn, tm


def true_dropout_forward(x, *, p=0.5, seed=0, training=True,
                         block_rows=512, block_cols=512):
    """x: (N, M). Training: (x * per-column(uniform>=p) * 1/(1-p)).T -> (M, N).
    Eval: x.T."""
    if p < 0.0 or p > 1.0:
        raise ValueError("p must be a probability")
    n, m = x.shape

    tn, tm = _pick_tiles(n, m, block_rows, block_cols)
    grid = (pl.cdiv(n, tn), pl.cdiv(m, tm))

    itemsize = jnp.dtype(x.dtype).itemsize
    cost = pl.CostEstimate(flops=n * m, transcendentals=0,
                           bytes_accessed=2 * n * m * itemsize + m * itemsize)
    cparams = pltpu.CompilerParams(
        dimension_semantics=("parallel", "parallel"))

    out_shape = jax.ShapeDtypeStruct((m, n), x.dtype)
    x_spec = pl.BlockSpec((tn, tm), lambda i, j: (i, j))
    out_spec = pl.BlockSpec((tm, tn), lambda i, j: (j, i))   # transposed placement

    if not training:
        return pl.pallas_call(
            _transpose_kernel,
            out_shape=out_shape,
            grid=grid,
            in_specs=[x_spec],
            out_specs=out_spec,
            compiler_params=cparams,
            cost_estimate=cost,
        )(x)

    # Per-column keep mask fused with the 1/(1-p) scale, computed once in the
    # wrapper (tiny (1, M) vector) and re-read per column block by BlockSpec.
    scale = (1.0 / (1.0 - p)) if p < 1.0 else 0.0     # p == 1 drops every column
    u = jax.random.uniform(jax.random.PRNGKey(seed), (1, m), dtype=jnp.float32)
    keep = jnp.where(u >= p, jnp.float32(scale), jnp.float32(0.0)).astype(x.dtype)

    return pl.pallas_call(
        _dropout_t_kernel,
        out_shape=out_shape,
        grid=grid,
        in_specs=[
            pl.BlockSpec((1, tm), lambda i, j: (0, j)),   # keep*scale vector
            x_spec,                                       # x tile
        ],
        out_specs=out_spec,
        compiler_params=cparams,
        cost_estimate=cost,
    )(keep, x)


if __name__ == "__main__":
    key = jax.random.PRNGKey(0)
    N, M = 256, 512                                  # x: (rows, feature columns)
    x = jax.random.normal(key, (N, M), dtype=jnp.float32)
    p, seed = 0.5, 0

    # --- training mode: per-column dropout + 1/(1-p) scale + transpose -------
    out = jax.block_until_ready(
        true_dropout_forward(x, p=p, seed=seed, training=True))
    assert out.shape == (M, N), out.shape

    scale = 1.0 / (1.0 - p)
    u = jax.random.uniform(jax.random.PRNGKey(seed), (1, M), dtype=jnp.float32)
    keep = jnp.where(u >= p, jnp.float32(scale), jnp.float32(0.0))
    expected = (x * keep).T
    assert jnp.allclose(out, expected, atol=1e-6, rtol=1e-6)

    # Every output row (== input column) is either fully kept*scale or fully 0.
    kept_rows = jnp.all(jnp.isclose(out, x.T * scale, atol=1e-5, rtol=1e-5), axis=1)
    dropped_rows = jnp.all(out == 0.0, axis=1)
    assert bool(jnp.all(kept_rows | dropped_rows))
    keep_frac = float(jnp.mean(kept_rows.astype(jnp.float32)))
    assert 0.2 < keep_frac < 0.8, keep_frac          # ~Binomial(M, 1-p); loose bound

    # --- eval mode: pure tiled transpose --------------------------------------
    out_eval = jax.block_until_ready(true_dropout_forward(x, p=p, training=False))
    assert out_eval.shape == (M, N)
    assert jnp.allclose(out_eval, x.T)

    print("KERNEL_OK")
</pallas_src>

<mosaic_0001>
module attributes {stable_mosaic.version = 11 : i64} {
  func.func @_dropout_t_kernel(%arg0: i32, %arg1: i32, %arg2: memref<1x512xf32, #tpu.memory_space<vmem>>, %arg3: memref<128x512xf32, #tpu.memory_space<vmem>>, %arg4: memref<512x128xf32, #tpu.memory_space<vmem>>) attributes {dimension_semantics = [#tpu.dimension_semantics<parallel>, #tpu.dimension_semantics<parallel>], iteration_bounds = array<i64: 2, 1>, scalar_prefetch = 0 : i64, scratch_operands = 0 : i64, tpu.core_type = #tpu.core_type<tc>, window_params = [{transform_indices = @transform_0, window_bounds = array<i64: 1, 512>}, {transform_indices = @transform_1, window_bounds = array<i64: 128, 512>}, {transform_indices = @transform_2, window_bounds = array<i64: 512, 128>}]} {
    %c0 = arith.constant 0 : index
    %c0_0 = arith.constant 0 : index
    %0 = vector.load %arg3[%c0, %c0_0] : memref<128x512xf32, #tpu.memory_space<vmem>>, vector<128x512xf32>
    %c0_1 = arith.constant 0 : index
    %c0_2 = arith.constant 0 : index
    %1 = vector.load %arg2[%c0_1, %c0_2] : memref<1x512xf32, #tpu.memory_space<vmem>>, vector<1x512xf32>
    %2 = vector.broadcast %1 : vector<1x512xf32> to vector<128x512xf32>
    %3 = arith.mulf %0, %2 : vector<128x512xf32>
    %4 = tpu.transpose %3, [1, 0] : vector<128x512xf32> -> vector<512x128xf32>
    %c0_3 = arith.constant 0 : index
    %c0_4 = arith.constant 0 : index
    %5 = vector.load %arg4[%c0_3, %c0_4] : memref<512x128xf32, #tpu.memory_space<vmem>>, vector<512x128xf32>
    tpu.vector_store %arg4[%c0_3, %c0_4], %4 {strides = array<i32>} : memref<512x128xf32, #tpu.memory_space<vmem>>, vector<512x128xf32>,
    return
  }
  func.func @transform_0(%arg0: i32, %arg1: i32) -> (i32, i32) {
    %c0_i32 = arith.constant 0 : i32
    %c0_i32_0 = arith.constant 0 : i32
    return %c0_i32, %arg1 : i32, i32
  }
  func.func @transform_1(%arg0: i32, %arg1: i32) -> (i32, i32) {
    %c0_i32 = arith.constant 0 : i32
    return %arg0, %arg1 : i32, i32
  }
  func.func @transform_2(%arg0: i32, %arg1: i32) -> (i32, i32) {
    %c0_i32 = arith.constant 0 : i32
    return %arg1, %arg0 : i32, i32
  }
}

</mosaic_0001>

<bundles_post_ra>
// kernel: tpu_custom_call.1
= control target key start
LH: loop header
LB: loop body
LE: loop exit
PB: predicated region body
PF: predicated region fallthrough
CT: control target
= control target key end

     0   :  { %7 = vsyncpa [#allocation3], 0  ;;  %s1360_s0 = inlined_call_operand.hbm [shape: f32[1,512], index: 0, kind: input, shape index: {}]   ;;  %s1361_s1 = inlined_call_operand.hbm [shape: f32[256,512], index: 1, kind: input, shape index: {}]   ;;  %s1362_s2 = inlined_call_operand.hbm [shape: f32[512,256], index: 2, kind: output, shape index: {}]  }
   0x1   :  { %8 = vsyncpa [#allocation6], 0 }
   0x2   :  { %10 = vsyncpa [#allocation6 + $0x1], 0 }
   0x3   :  { %11 = vsyncpa [#allocation4], 0 }
   0x4   :  { %13 = vsyncpa [#allocation4 + $0x1], 0  ;;  %s930_s9 = smov 0   ;;  %s932_s10 = smov 0  }
   0x5   :  { %s934_s11 = smov 0   ;;  %s936_s12 = smov 0  }
   0x6   :  { %s938_s13 = smov 0   ;;  %s940_s14 = smov 0  }
   0x7 LB: > { %s664_s15 = sadd.s32 4294967295, %s905_s14   ;;  %s665_s16 = sadd.s32 4294967294, %s905_s14   ;;  %s905_s14 = sphi %s940_s14, %s19_s14   ;;  %s901_s13 = sphi %s938_s13, %s1390_s13   ;;  %s897_s12 = sphi %s936_s12, %s1389_s12   ;;  %s893_s11 = sphi %s934_s11, %s1388_s11   ;;  %s889_s10 = sphi %s932_s10, %s1387_s10   ;;  %s885_s9 = sphi %s930_s9, %s1386_s9  }
   0x8   : > { %s66_s17 = sadd.s32 1, %s893_s11  ;;  %p73_p0 = scmp.ne.s32.totalorder %s893_s11, %s889_s10 }
   0x9   : > { %p74_p1 = scmp.eq.s32.totalorder %s905_s14, 0  ;;  %p79_p2 = scmp.ne.s32.totalorder %s889_s10, %s885_s9 }
   0xa   : > { %p968_p3 = scmp.eq.s32.totalorder %s664_s15, 0  ;;  %p105_p4 = scmp.eq.s32.totalorder %s664_s15, 1 }
   0xb   : > { %p972_p5 = por %p74_p1, %p73_p0  ;;  %p111_p6 = scmp.eq.s32.totalorder %s665_s16, 1 }
   0xc   : > { %s1369_s18 = scalar_select %p968_p3, 1, 0 }
   0xd   : > { %p978_p7 = por %p968_p3, %p79_p2  ;;  %p982_p8 = por %p105_p4, %p73_p0 }
   0xe   : > { %p986_p9 = por %p111_p6, %p79_p2  ;;  %p666_p10 = scmp.ge.s32.totalorder %s905_s14, 1 }
   0xf   : > { %s1371_s20 = scalar_select %p978_p7, 1, 0 }
  0x10   : > { %s1372_s21 = scalar_select %p982_p8, 1, 0 }
  0x11   : > { %s1373_s22 = scalar_select %p986_p9, 1, 0 }
  0x12   : > { %p118_p11 = scmp.lt.s32.totalorder %s905_s14, 3  ;;  %s907_s24 = smov [#allocation2]  }
  0x13   : > { %s134_s25 = sshll.u32 %s907_s24, 4  ;;  %p704_p1 = scmp.lt.s32.totalorder %s905_s14, 2  ;;  %s135_s25 = int_to_ptr.vmem [resolvable:$true] %s134_s25 }
  0x14   : > { %p993_p13 = pnand %p666_p10, %p118_p11  ;;  %s31_s28 = sadd.s32 1, %s901_s13 }
  0x15   : > { %p1002_p4 = pnand %p704_p1, %p972_p5  ;;  %p1013_p6 = scmp.ge.s32.totalorder %s31_s28, 2 }
  0x16   : > { %s1374_s23 = scalar_select %p993_p13, 1, 0 }
  0x17   : > { %p691_p0 = pneg %p993_p13  ;;  %s145_s30 = sand.u32 1, %s893_s11  }
  0x18   : > { %s1375_s26 = scalar_select %p1002_p4, 1, 0 }
  0x19   : > { %p1008_p2 = pnand %p691_p0, %p968_p3  ;;  %s761_s5 = scalar_lea.hbm %s1360_s0, 64 }
  0x1a   : > { %s1377_s29 = scalar_select %p1013_p6, 1, 0 }
  0x1b   : > { %p762_p5 = scmp.ne.s32.totalorder %s1360_s0, %s761_s5  ;;  %p763_p10 = pneg %p1008_p2 }
  0x1c   : > { %p768_p0 = scmp.lt.u32.totalorder %s761_s5, %s1360_s0 }
  0x1d   : > { %p764_p11 = pnand %p763_p10, %p762_p5 }
  0x1f   : > { %p765_p1 = pneg %p764_p11 }
  0x21   : > { %p770_p12 = pnand %p768_p0, %p765_p1 }
  0x23   : > { %773 = shalt.err (!%p770_p12)
}
  0x24   : > { %s774_s16 = scalar_lea.vmem %s135_s25, 64  ;;  %p782_p3 = scmp.lt.s32.totalorder %s135_s25, %s135_s25 }
  0x25   : > { %p775_p9 = scmp.ne.s32.totalorder %s135_s25, %s774_s16  ;;  %p783_p13 = scmp.lt.s32.totalorder %s774_s16, %s774_s16 }
  0x27   : > { %p777_p8 = pnand %p775_p9, %p763_p10  ;;  %p784_p4 = por %p783_p13, %p782_p3 }
  0x29   : > { %p778_p7 = pneg %p777_p8 }
  0x2b   : > { %p785_p6 = pnand %p784_p4, %p778_p7 }
  0x2d   : > { %788 = shalt.err (!%p785_p6)
}
  0x2e   : > { %694 = dma.hbm_to_vmem [thread:$0]  (!%p1008_p2), %s1360_s0, 64, %s135_s25, [#allocation3]  }
  0x2f   : > { %p1378_p9 = scmp.ne.s32.totalorder %s1377_s29, 0  ;;  %s669_s3 = sshll.u32 %s145_s30, 9 }
  0x30   : > { %s682_s5 = sshll.u32 %s901_s13, 13  ;;  %s149_s8 = scalar_lea.vmem [#allocation5], %s669_s3 }
  0x31   : > { %s1392_s28 = smov (%p1378_p9, %s31_s28), 0  ;;  %s1044_s7 = scalar_lea.hbm %s1361_s1, %s682_s5 }
  0x32   : > { %s61_s4 = ssub.s32 %s901_s13, %s1392_s28  ;;  %s159_s15 = sshll.u32 %s149_s8, 4  ;;  %s1051_s15 = int_to_ptr.vmem [resolvable:$true] %s159_s15 }
  0x33   : > { %p64_p3 = scmp.eq.s32.totalorder %s61_s4, 0  ;;  %s1053_s29 = scalar_lea.sflag [#allocation6], %s145_s30 }
  0x34   : > { %s789_s16 = scalar_lea.hbm %s1044_s7, 8192  ;;  %p1379_p8 = scmp.ne.s32.totalorder %s1375_s26, 0 }
  0x35   : > { %s1049_s25 = scalar_select %p64_p3, %s893_s11, %s66_s17  }
  0x36   : > { %p790_p7 = scmp.ne.s32.totalorder %s1044_s7, %s789_s16  ;;  %p791_p12 = pneg %p1379_p8 }
  0x37   : > { %s794_s3 = scalar_lea.hbm %s1361_s1, 16384  ;;  %p795_p2 = scmp.lt.u32.totalorder %s1044_s7, %s1361_s1 }
  0x38   : > { %p792_p13 = pnand %p791_p12, %p790_p7  ;;  %p796_p6 = scmp.lt.u32.totalorder %s794_s3, %s789_s16 }
  0x39   : > { %p798_p10 = scmp.lt.u32.totalorder %s789_s16, %s1044_s7 }
  0x3a   : > { %p793_p4 = pneg %p792_p13  ;;  %p797_p5 = por %p796_p6, %p795_p2 }
  0x3c   : > { %p799_p11 = por %p798_p10, %p797_p5 }
  0x3e   : > { %p800_p1 = pnand %p799_p11, %p793_p4 }
  0x40   : > { %803 = shalt.err (!%p800_p1)
}
  0x41   : > { %s804_s17 = scalar_lea.vmem %s1051_s15, 8192  ;;  %s908_s30 = smov [#allocation5]  }
  0x42   : > { %p805_p0 = scmp.ne.s32.totalorder %s1051_s15, %s804_s17  ;;  %s809_s27 = sshll.u32 %s908_s30, 4  ;;  %s810_s27 = int_to_ptr.vmem [resolvable:$false] %s809_s27 }
  0x43   : > { %s811_s6 = scalar_lea.vmem %s810_s27, 16384  ;;  %p812_p7 = scmp.lt.s32.totalorder %s1051_s15, %s810_s27 }
  0x44   : > { %p807_p9 = pnand %p805_p0, %p791_p12  ;;  %p813_p13 = scmp.lt.s32.totalorder %s811_s6, %s804_s17 }
  0x46   : > { %p808_p3 = pneg %p807_p9  ;;  %p814_p2 = por %p813_p13, %p812_p7 }
  0x48   : > { %p815_p6 = pnand %p814_p2, %p808_p3 }
  0x4a   : > { %818 = shalt.err (!%p815_p6)
}
  0x4b   : > { %s909_s8 = smov 512   ;;  %s910_s16 = smov 32  }
  0x4c   : > { %698 = dma.hbm_to_vmem [thread:$0]  (!%p1379_p8), %s1044_s7, 8192, %s1051_s15, %s1053_s29, %s909_s8, %s909_s8, %s910_s16  }
  0x4d   : > { %p1380_p12 = scmp.ne.s32.totalorder %s1374_s23, 0 }
  0x4e   : > { %p1381_p4 = scmp.ne.s32.totalorder (!%p1380_p12), %s1369_s18, 0 }
  0x4f   : > { %171 = sbr.rel (%p1380_p12) target bundleno = 370 (0x172), region = 28 }
  0x56   : > { %872 = dma.done.wait (%p1381_p4), [#allocation3], 64  }
  0x57   : > { %874 = vsyncadd (%p1381_p4), [#allocation3], 4294967232  ;;  %s1088_s19 = sand.u32 1, %s889_s10   ;;  %p1382_p8 = scmp.ne.s32.totalorder %s1371_s20, 0 }
  0x58   : > { %s675_s24 = sshll.u32 %s1088_s19, 9  ;;  %s178_s3 = scalar_lea.sflag [#allocation6], %s1088_s19 }
  0x59   : > { %s1094_s26 = scalar_lea.vmem [#allocation5], %s675_s24 }
  0x5a   : > { %876 = dma.done.wait (%p1382_p8), %s178_s3, 8192  }
  0x5b   : > { %878 = vsyncadd (%p1382_p8), %s178_s3, 4294959104  ;;  %v272_v0 = vlaneseq  ;;  %v207_v6 = vld [vmem:[%s1094_s26 + $0x8] sm:$0xff]  ;;  %v270_v7 = vld [vmem:[#allocation2] sm:$0xf]  ;;  %s1238_s18 = scalar_lea.vmem [#allocation7], %s675_s24  ;;  %s678_s20 = sshll.u32 %s897_s12, 7 }
  0x5c   : > { %v206_v8 = vld [vmem:[%s1094_s26] sm:$0xff]  ;;  %v211_v13 = vld [vmem:[%s1094_s26 + $0x28] sm:$0xff]  ;;  %s564_s23 = sshll.u32 %s1238_s18, 4  ;;  %s1307_s29 = scalar_lea.hbm %s1362_s2, %s678_s20  ;;  %s1309_s23 = int_to_ptr.vmem [resolvable:$true] %s564_s23 }
  0x5d   : > { %v273_v1 = vshrl.u32 %v272_v0, 7  ;;  %v210_v14 = vld [vmem:[%s1094_s26 + $0x20] sm:$0xff]  ;;  %v215_v19 = vld [vmem:[%s1094_s26 + $0x48] sm:$0xff]  ;;  %s549_s12 = scalar_lea.sflag [#allocation4], %s1088_s19  ;;  %s819_s4 = scalar_lea.vmem %s1309_s23, 8192 }
  0x5e   : > { %v214_v20 = vld [vmem:[%s1094_s26 + $0x40] sm:$0xff]  ;;  %v219_v23 = vld [vmem:[%s1094_s26 + $0x68] sm:$0xff]  ;;  %p820_p5 = scmp.ne.s32.totalorder %s1309_s23, %s819_s4  ;;  %p1383_p10 = scmp.ne.s32.totalorder %s1372_s21, 0 }
  0x5f   : > { %v278_v2 = vsub.s32 1, %v273_v1  ;;  %v274_v3 = vsub.s32 0, %v273_v1  ;;  %v286_v4 = vsub.s32 3, %v273_v1  ;;  %v282_v5 = vsub.s32 2, %v273_v1  ;;  %v218_v24 = vld [vmem:[%s1094_s26 + $0x60] sm:$0xff]  ;;  %v223_v27 = vld [vmem:[%s1094_s26 + $0x88] sm:$0xff] }
  0x60   : > { %v222_v28 = vld [vmem:[%s1094_s26 + $0x80] sm:$0xff]  ;;  %v227_v31 = vld [vmem:[%s1094_s26 + $0xa8] sm:$0xff]  ;;  %p821_p11 = pnand %p820_p5, %p1383_p10  ;;  %s911_s5 = smov [#allocation7]  }
  0x61   : > { %v1102_v9 = vrot.slane %v270_v7, %v278_v2  ;;  %v1104_v10 = vrot.slane %v270_v7, %v274_v3  ;;  %v1106_v11 = vrot.slane %v270_v7, %v286_v4  ;;  %v1108_v12 = vrot.slane %v270_v7, %v282_v5  ;;  %v226_v32 = vld [vmem:[%s1094_s26 + $0xa0] sm:$0xff]  ;;  %v231_v35 = vld [vmem:[%s1094_s26 + $0xc8] sm:$0xff]  ;;  %s823_s17 = sshll.u32 %s911_s5, 4  ;;  %s824_s17 = int_to_ptr.vmem [resolvable:$false] %s823_s17 }
  0x62   : > { %v230_v36 = vld [vmem:[%s1094_s26 + $0xc0] sm:$0xff]  ;;  %v235_v39 = vld [vmem:[%s1094_s26 + $0xe8] sm:$0xff]  ;;  %p822_p1 = pneg %p821_p11  ;;  %s825_s30 = scalar_lea.vmem %s824_s17, 16384 }
  0x63   : > { %v293_v15 = vmul.f32 %v1102_v9, %v207_v6  ;;  %v292_v16 = vmul.f32 %v1104_v10, %v206_v8  ;;  %v297_v17 = vmul.f32 %v1102_v9, %v211_v13  ;;  %v296_v18 = vmul.f32 %v1104_v10, %v210_v14  ;;  %v234_v40 = vld [vmem:[%s1094_s26 + $0xe0] sm:$0xff]  ;;  %v239_v43 = vld [vmem:[%s1094_s26 + $0x108] sm:$0xff]  ;;  %p826_p0 = scmp.lt.s32.totalorder %s1309_s23, %s824_s17  ;;  %p827_p9 = scmp.lt.s32.totalorder %s825_s30, %s819_s4 }
  0x64   : > { %v301_v21 = vmul.f32 %v1102_v9, %v215_v19  ;;  %v300_v22 = vmul.f32 %v1104_v10, %v214_v20  ;;  %v305_v25 = vmul.f32 %v1102_v9, %v219_v23  ;;  %v304_v26 = vmul.f32 %v1104_v10, %v218_v24  ;;  %v238_v44 = vld [vmem:[%s1094_s26 + $0x100] sm:$0xff]  ;;  %v243_v47 = vld [vmem:[%s1094_s26 + $0x128] sm:$0xff]  ;;  %v213_v19 = vld [vmem:[%s1094_s26 + $0x38] sm:$0xff] }
  0x65   : > { %388 = vxpose.xlu1.b32.start [1/16] %v293_v15, 128  ;;  %356 = vxpose.xlu0.b32.start [1/16] %v292_v16, 128  ;;  %v309_v29 = vmul.f32 %v1102_v9, %v223_v27  ;;  %v308_v30 = vmul.f32 %v1104_v10, %v222_v28  ;;  %v313_v33 = vmul.f32 %v1102_v9, %v227_v31  ;;  %v242_v48 = vld [vmem:[%s1094_s26 + $0x120] sm:$0xff]  ;;  %v247_v51 = vld [vmem:[%s1094_s26 + $0x148] sm:$0xff]  ;;  %v209_v15 = vld [vmem:[%s1094_s26 + $0x18] sm:$0xff]  ;;  %p828_p3 = por %p827_p9, %p826_p0 }
  0x66   : > { %v312_v34 = vmul.f32 %v1104_v10, %v226_v32  ;;  %v317_v37 = vmul.f32 %v1102_v9, %v231_v35  ;;  %v316_v38 = vmul.f32 %v1104_v10, %v230_v36  ;;  %v321_v41 = vmul.f32 %v1102_v9, %v235_v39  ;;  %v246_v52 = vld [vmem:[%s1094_s26 + $0x140] sm:$0xff]  ;;  %v251_v55 = vld [vmem:[%s1094_s26 + $0x168] sm:$0xff]  ;;  %v208_v16 = vld [vmem:[%s1094_s26 + $0x10] sm:$0xff] }
  0x67   : > { %v320_v42 = vmul.f32 %v1104_v10, %v234_v40  ;;  %v325_v45 = vmul.f32 %v1102_v9, %v239_v43  ;;  %v324_v46 = vmul.f32 %v1104_v10, %v238_v44  ;;  %v329_v49 = vmul.f32 %v1102_v9, %v243_v47  ;;  %v250_v56 = vld [vmem:[%s1094_s26 + $0x160] sm:$0xff]  ;;  %v255_v59 = vld [vmem:[%s1094_s26 + $0x188] sm:$0xff]  ;;  %v212_v20 = vld [vmem:[%s1094_s26 + $0x30] sm:$0xff]  ;;  %p829_p7 = pnand %p828_p3, %p822_p1 }
  0x68   : > { %v328_v50 = vmul.f32 %v1104_v10, %v242_v48  ;;  %v333_v53 = vmul.f32 %v1102_v9, %v247_v51  ;;  %v332_v54 = vmul.f32 %v1104_v10, %v246_v52  ;;  %v337_v57 = vmul.f32 %v1102_v9, %v251_v55  ;;  %v254_v60 = vld [vmem:[%s1094_s26 + $0x180] sm:$0xff]  ;;  %v259_v63 = vld [vmem:[%s1094_s26 + $0x1a8] sm:$0xff] }
  0x69   : > { %389 = vxpose.xlu1.b32.cont [2/16] %v297_v17, 128  ;;  %357 = vxpose.xlu0.b32.cont [2/16] %v296_v18, 128  ;;  %v336_v58 = vmul.f32 %v1104_v10, %v250_v56  ;;  %v341_v61 = vmul.f32 %v1102_v9, %v255_v59  ;;  %v340_v62 = vmul.f32 %v1104_v10, %v254_v60  ;;  %v258_v0 = vld [vmem:[%s1094_s26 + $0x1a0] sm:$0xff]  ;;  %v263_v3 = vld [vmem:[%s1094_s26 + $0x1c8] sm:$0xff] }
  0x6a   : > { %v345_v1 = vmul.f32 %v1102_v9, %v259_v63  ;;  %v344_v2 = vmul.f32 %v1104_v10, %v258_v0  ;;  %v262_v4 = vld [vmem:[%s1094_s26 + $0x1c0] sm:$0xff]  ;;  %v349_v5 = vmul.f32 %v1102_v9, %v263_v3  ;;  %v267_v7 = vld [vmem:[%s1094_s26 + $0x1e8] sm:$0xff]  ;;  %v295_v17 = vmul.f32 %v1106_v11, %v209_v15 }
  0x6b   : > { %v348_v6 = vmul.f32 %v1104_v10, %v262_v4  ;;  %v266_v8 = vld [vmem:[%s1094_s26 + $0x1e0] sm:$0xff]  ;;  %v353_v13 = vmul.f32 %v1102_v9, %v267_v7  ;;  %v294_v18 = vmul.f32 %v1108_v12, %v208_v16  ;;  %v299_v9 = vmul.f32 %v1106_v11, %v213_v19 }
  0x6c   : > { %v352_v14 = vmul.f32 %v1104_v10, %v266_v8  ;;  %v298_v10 = vmul.f32 %v1108_v12, %v212_v20 }
  0x6d   : > { %390 = vxpose.xlu1.b32.cont [3/16] %v301_v21, 128  ;;  %358 = vxpose.xlu0.b32.cont [3/16] %v300_v22, 128  ;;  %v217_v21 = vld [vmem:[%s1094_s26 + $0x58] sm:$0xff]  ;;  %v216_v22 = vld [vmem:[%s1094_s26 + $0x50] sm:$0xff] }
  0x6e   : > { %v303_v23 = vmul.f32 %v1106_v11, %v217_v21  ;;  %v302_v24 = vmul.f32 %v1108_v12, %v216_v22 }
  0x71   : > { %391 = vxpose.xlu1.b32.cont [4/16] %v305_v25, 128  ;;  %359 = vxpose.xlu0.b32.cont [4/16] %v304_v26, 128  ;;  %v221_v25 = vld [vmem:[%s1094_s26 + $0x78] sm:$0xff]  ;;  %v220_v26 = vld [vmem:[%s1094_s26 + $0x70] sm:$0xff] }
  0x72   : > { %v307_v27 = vmul.f32 %v1106_v11, %v221_v25  ;;  %v306_v28 = vmul.f32 %v1108_v12, %v220_v26 }
  0x75   : > { %392 = vxpose.xlu1.b32.cont [5/16] %v309_v29, 128  ;;  %360 = vxpose.xlu0.b32.cont [5/16] %v308_v30, 128  ;;  %v225_v29 = vld [vmem:[%s1094_s26 + $0x98] sm:$0xff]  ;;  %v224_v30 = vld [vmem:[%s1094_s26 + $0x90] sm:$0xff] }
  0x76   : > { %v311_v31 = vmul.f32 %v1106_v11, %v225_v29  ;;  %v310_v32 = vmul.f32 %v1108_v12, %v224_v30 }
  0x79   : > { %393 = vxpose.xlu1.b32.cont [6/16] %v313_v33, 128  ;;  %361 = vxpose.xlu0.b32.cont [6/16] %v312_v34, 128  ;;  %v229_v33 = vld [vmem:[%s1094_s26 + $0xb8] sm:$0xff]  ;;  %v228_v34 = vld [vmem:[%s1094_s26 + $0xb0] sm:$0xff] }
  0x7a   : > { %v315_v35 = vmul.f32 %v1106_v11, %v229_v33  ;;  %v314_v36 = vmul.f32 %v1108_v12, %v228_v34 }
  0x7d   : > { %394 = vxpose.xlu1.b32.cont [7/16] %v317_v37, 128  ;;  %362 = vxpose.xlu0.b32.cont [7/16] %v316_v38, 128  ;;  %v233_v37 = vld [vmem:[%s1094_s26 + $0xd8] sm:$0xff]  ;;  %v232_v38 = vld [vmem:[%s1094_s26 + $0xd0] sm:$0xff] }
  0x7e   : > { %v319_v39 = vmul.f32 %v1106_v11, %v233_v37  ;;  %v318_v40 = vmul.f32 %v1108_v12, %v232_v38 }
  0x81   : > { %395 = vxpose.xlu1.b32.cont [8/16] %v321_v41, 128  ;;  %363 = vxpose.xlu0.b32.cont [8/16] %v320_v42, 128  ;;  %v237_v41 = vld [vmem:[%s1094_s26 + $0xf8] sm:$0xff]  ;;  %v236_v42 = vld [vmem:[%s1094_s26 + $0xf0] sm:$0xff] }
  0x82   : > { %v323_v43 = vmul.f32 %v1106_v11, %v237_v41  ;;  %v322_v44 = vmul.f32 %v1108_v12, %v236_v42 }
  0x85   : > { %396 = vxpose.xlu1.b32.cont [9/16] %v325_v45, 128  ;;  %364 = vxpose.xlu0.b32.cont [9/16] %v324_v46, 128  ;;  %v241_v45 = vld [vmem:[%s1094_s26 + $0x118] sm:$0xff]  ;;  %v240_v46 = vld [vmem:[%s1094_s26 + $0x110] sm:$0xff] }
  0x86   : > { %v327_v47 = vmul.f32 %v1106_v11, %v241_v45  ;;  %v326_v48 = vmul.f32 %v1108_v12, %v240_v46 }
  0x89   : > { %397 = vxpose.xlu1.b32.cont [10/16] %v329_v49, 128  ;;  %365 = vxpose.xlu0.b32.cont [10/16] %v328_v50, 128  ;;  %v245_v49 = vld [vmem:[%s1094_s26 + $0x138] sm:$0xff]  ;;  %v244_v50 = vld [vmem:[%s1094_s26 + $0x130] sm:$0xff] }
  0x8a   : > { %v331_v51 = vmul.f32 %v1106_v11, %v245_v49  ;;  %v330_v52 = vmul.f32 %v1108_v12, %v244_v50 }
  0x8d   : > { %398 = vxpose.xlu1.b32.cont [11/16] %v333_v53, 128  ;;  %366 = vxpose.xlu0.b32.cont [11/16] %v332_v54, 128  ;;  %v249_v53 = vld [vmem:[%s1094_s26 + $0x158] sm:$0xff]  ;;  %v248_v54 = vld [vmem:[%s1094_s26 + $0x150] sm:$0xff] }
  0x8e   : > { %v335_v55 = vmul.f32 %v1106_v11, %v249_v53  ;;  %v334_v56 = vmul.f32 %v1108_v12, %v248_v54 }
  0x91   : > { %399 = vxpose.xlu1.b32.cont [12/16] %v337_v57, 128  ;;  %367 = vxpose.xlu0.b32.cont [12/16] %v336_v58, 128  ;;  %v253_v57 = vld [vmem:[%s1094_s26 + $0x178] sm:$0xff]  ;;  %v252_v58 = vld [vmem:[%s1094_s26 + $0x170] sm:$0xff] }
  0x92   : > { %v339_v59 = vmul.f32 %v1106_v11, %v253_v57  ;;  %v338_v60 = vmul.f32 %v1108_v12, %v252_v58 }
  0x95   : > { %400 = vxpose.xlu1.b32.cont [13/16] %v341_v61, 128  ;;  %368 = vxpose.xlu0.b32.cont [13/16] %v340_v62, 128  ;;  %v257_v61 = vld [vmem:[%s1094_s26 + $0x198] sm:$0xff]  ;;  %v256_v62 = vld [vmem:[%s1094_s26 + $0x190] sm:$0xff] }
  0x96   : > { %v343_v63 = vmul.f32 %v1106_v11, %v257_v61  ;;  %v342_v0 = vmul.f32 %v1108_v12, %v256_v62 }
  0x99   : > { %401 = vxpose.xlu1.b32.cont [14/16] %v345_v1, 128  ;;  %369 = vxpose.xlu0.b32.cont [14/16] %v344_v2, 128  ;;  %v261_v1 = vld [vmem:[%s1094_s26 + $0x1b8] sm:$0xff]  ;;  %v260_v2 = vld [vmem:[%s1094_s26 + $0x1b0] sm:$0xff] }
  0x9a   : > { %v347_v3 = vmul.f32 %v1106_v11, %v261_v1  ;;  %v346_v4 = vmul.f32 %v1108_v12, %v260_v2 }
  0x9d   : > { %402 = vxpose.xlu1.b32.cont [15/16] %v349_v5, 128  ;;  %370 = vxpose.xlu0.b32.cont [15/16] %v348_v6, 128  ;;  %v265_v5 = vld [vmem:[%s1094_s26 + $0x1d8] sm:$0xff]  ;;  %v264_v6 = vld [vmem:[%s1094_s26 + $0x1d0] sm:$0xff] }
  0x9e   : > { %v351_v7 = vmul.f32 %v1106_v11, %v265_v5  ;;  %v350_v8 = vmul.f32 %v1108_v12, %v264_v6 }
  0xa1   : > { %403 = vxpose.xlu1.b32.end [16/16] %v353_v13, 128  ;;  %371 = vxpose.xlu0.b32.end [16/16] %v352_v14, 128  ;;  %v269_v13 = vld [vmem:[%s1094_s26 + $0x1f8] sm:$0xff]  ;;  %v268_v14 = vld [vmem:[%s1094_s26 + $0x1f0] sm:$0xff] }
  0xa2   : > { %v355_v15 = vmul.f32 %v1106_v11, %v269_v13  ;;  %v354_v16 = vmul.f32 %v1108_v12, %v268_v14 }
  0xa5   : > { %452 = vxpose.xlu1.b32.start [1/16] %v295_v17, 128  ;;  %420 = vxpose.xlu0.b32.start [1/16] %v294_v18, 128 }
  0xa9   : > { %453 = vxpose.xlu1.b32.cont [2/16] %v299_v9, 128  ;;  %421 = vxpose.xlu0.b32.cont [2/16] %v298_v10, 128 }
  0xad   : > { %454 = vxpose.xlu1.b32.cont [3/16] %v303_v23, 128  ;;  %422 = vxpose.xlu0.b32.cont [3/16] %v302_v24, 128 }
  0xb1   : > { %455 = vxpose.xlu1.b32.cont [4/16] %v307_v27, 128  ;;  %423 = vxpose.xlu0.b32.cont [4/16] %v306_v28, 128 }
  0xb5   : > { %456 = vxpose.xlu1.b32.cont [5/16] %v311_v31, 128  ;;  %424 = vxpose.xlu0.b32.cont [5/16] %v310_v32, 128 }
  0xb9   : > { %457 = vxpose.xlu1.b32.cont [6/16] %v315_v35, 128  ;;  %425 = vxpose.xlu0.b32.cont [6/16] %v314_v36, 128 }
  0xbd   : > { %458 = vxpose.xlu1.b32.cont [7/16] %v319_v39, 128  ;;  %426 = vxpose.xlu0.b32.cont [7/16] %v318_v40, 128 }
  0xc1   : > { %459 = vxpose.xlu1.b32.cont [8/16] %v323_v43, 128  ;;  %427 = vxpose.xlu0.b32.cont [8/16] %v322_v44, 128 }
  0xc5   : > { %460 = vxpose.xlu1.b32.cont [9/16] %v327_v47, 128  ;;  %428 = vxpose.xlu0.b32.cont [9/16] %v326_v48, 128 }
  0xc9   : > { %461 = vxpose.xlu1.b32.cont [10/16] %v331_v51, 128  ;;  %429 = vxpose.xlu0.b32.cont [10/16] %v330_v52, 128 }
  0xcd   : > { %462 = vxpose.xlu1.b32.cont [11/16] %v335_v55, 128  ;;  %430 = vxpose.xlu0.b32.cont [11/16] %v334_v56, 128 }
  0xd1   : > { %463 = vxpose.xlu1.b32.cont [12/16] %v339_v59, 128  ;;  %431 = vxpose.xlu0.b32.cont [12/16] %v338_v60, 128 }
  0xd5   : > { %464 = vxpose.xlu1.b32.cont [13/16] %v343_v63, 128  ;;  %432 = vxpose.xlu0.b32.cont [13/16] %v342_v0, 128 }
  0xd9   : > { %465 = vxpose.xlu1.b32.cont [14/16] %v347_v3, 128  ;;  %433 = vxpose.xlu0.b32.cont [14/16] %v346_v4, 128 }
  0xdd   : > { %466 = vxpose.xlu1.b32.cont [15/16] %v351_v7, 128  ;;  %434 = vxpose.xlu0.b32.cont [15/16] %v350_v8, 128 }
  0xe1   : > { %467 = vxpose.xlu1.b32.end [16/16] %v355_v15, 128  ;;  %435 = vxpose.xlu0.b32.end [16/16] %v354_v16, 128 }
  0xe5   : > { %v404_v17 = vpop.trf.xlu1  ;;  %v372_v18 = vpop.trf.xlu0 }
  0xe6   : > { %500 = vst [vmem:[%s1238_s18 + $0x80] sm:$0xff] %v404_v17  ;;  %484 = vst [vmem:[%s1238_s18] sm:$0xff] %v372_v18 }
  0xe9   : > { %v405_v11 = vpop.trf.xlu1  ;;  %v373_v12 = vpop.trf.xlu0 }
  0xea   : > { %501 = vst [vmem:[%s1238_s18 + $0x88] sm:$0xff] %v405_v11  ;;  %485 = vst [vmem:[%s1238_s18 + $0x8] sm:$0xff] %v373_v12 }
  0xed   : > { %v406_v19 = vpop.trf.xlu1  ;;  %v374_v20 = vpop.trf.xlu0 }
  0xee   : > { %502 = vst [vmem:[%s1238_s18 + $0x90] sm:$0xff] %v406_v19  ;;  %486 = vst [vmem:[%s1238_s18 + $0x10] sm:$0xff] %v374_v20 }
  0xf1   : > { %v407_v9 = vpop.trf.xlu1  ;;  %v375_v10 = vpop.trf.xlu0 }
  0xf2   : > { %503 = vst [vmem:[%s1238_s18 + $0x98] sm:$0xff] %v407_v9  ;;  %487 = vst [vmem:[%s1238_s18 + $0x18] sm:$0xff] %v375_v10 }
  0xf5   : > { %v408_v21 = vpop.trf.xlu1  ;;  %v376_v22 = vpop.trf.xlu0 }
  0xf6   : > { %504 = vst [vmem:[%s1238_s18 + $0xa0] sm:$0xff] %v408_v21  ;;  %488 = vst [vmem:[%s1238_s18 + $0x20] sm:$0xff] %v376_v22 }
  0xf9   : > { %v409_v23 = vpop.trf.xlu1  ;;  %v377_v24 = vpop.trf.xlu0 }
  0xfa   : > { %505 = vst [vmem:[%s1238_s18 + $0xa8] sm:$0xff] %v409_v23  ;;  %489 = vst [vmem:[%s1238_s18 + $0x28] sm:$0xff] %v377_v24 }
  0xfd   : > { %v410_v25 = vpop.trf.xlu1  ;;  %v378_v26 = vpop.trf.xlu0 }
  0xfe   : > { %506 = vst [vmem:[%s1238_s18 + $0xb0] sm:$0xff] %v410_v25  ;;  %490 = vst [vmem:[%s1238_s18 + $0x30] sm:$0xff] %v378_v26 }
 0x101   : > { %v411_v27 = vpop.trf.xlu1  ;;  %v379_v28 = vpop.trf.xlu0 }
 0x102   : > { %507 = vst [vmem:[%s1238_s18 + $0xb8] sm:$0xff] %v411_v27  ;;  %491 = vst [vmem:[%s1238_s18 + $0x38] sm:$0xff] %v379_v28 }
 0x105   : > { %v412_v29 = vpop.trf.xlu1  ;;  %v380_v30 = vpop.trf.xlu0 }
 0x106   : > { %508 = vst [vmem:[%s1238_s18 + $0xc0] sm:$0xff] %v412_v29  ;;  %492 = vst [vmem:[%s1238_s18 + $0x40] sm:$0xff] %v380_v30 }
 0x109   : > { %v413_v31 = vpop.trf.xlu1  ;;  %v381_v32 = vpop.trf.xlu0 }
 0x10a   : > { %509 = vst [vmem:[%s1238_s18 + $0xc8] sm:$0xff] %v413_v31  ;;  %493 = vst [vmem:[%s1238_s18 + $0x48] sm:$0xff] %v381_v32 }
 0x10d   : > { %v414_v33 = vpop.trf.xlu1  ;;  %v382_v34 = vpop.trf.xlu0 }
 0x10e   : > { %510 = vst [vmem:[%s1238_s18 + $0xd0] sm:$0xff] %v414_v33  ;;  %494 = vst [vmem:[%s1238_s18 + $0x50] sm:$0xff] %v382_v34 }
 0x111   : > { %v415_v35 = vpop.trf.xlu1  ;;  %v383_v36 = vpop.trf.xlu0 }
 0x112   : > { %511 = vst [vmem:[%s1238_s18 + $0xd8] sm:$0xff] %v415_v35  ;;  %495 = vst [vmem:[%s1238_s18 + $0x58] sm:$0xff] %v383_v36 }
 0x115   : > { %v416_v37 = vpop.trf.xlu1  ;;  %v384_v38 = vpop.trf.xlu0 }
 0x116   : > { %512 = vst [vmem:[%s1238_s18 + $0xe0] sm:$0xff] %v416_v37  ;;  %496 = vst [vmem:[%s1238_s18 + $0x60] sm:$0xff] %v384_v38 }
 0x119   : > { %v417_v39 = vpop.trf.xlu1  ;;  %v385_v40 = vpop.trf.xlu0 }
 0x11a   : > { %513 = vst [vmem:[%s1238_s18 + $0xe8] sm:$0xff] %v417_v39  ;;  %497 = vst [vmem:[%s1238_s18 + $0x68] sm:$0xff] %v385_v40 }
 0x11d   : > { %v418_v41 = vpop.trf.xlu1  ;;  %v386_v42 = vpop.trf.xlu0 }
 0x11e   : > { %514 = vst [vmem:[%s1238_s18 + $0xf0] sm:$0xff] %v418_v41  ;;  %498 = vst [vmem:[%s1238_s18 + $0x70] sm:$0xff] %v386_v42 }
 0x121   : > { %v419_v43 = vpop.trf.xlu1  ;;  %v387_v44 = vpop.trf.xlu0 }
 0x122   : > { %515 = vst [vmem:[%s1238_s18 + $0xf8] sm:$0xff] %v419_v43  ;;  %499 = vst [vmem:[%s1238_s18 + $0x78] sm:$0xff] %v387_v44 }
 0x125   : > { %v468_v45 = vpop.trf.xlu1  ;;  %v436_v46 = vpop.trf.xlu0 }
 0x126   : > { %532 = vst [vmem:[%s1238_s18 + $0x180] sm:$0xff] %v468_v45  ;;  %516 = vst [vmem:[%s1238_s18 + $0x100] sm:$0xff] %v436_v46 }
 0x129   : > { %v469_v47 = vpop.trf.xlu1  ;;  %v437_v48 = vpop.trf.xlu0 }
 0x12a   : > { %533 = vst [vmem:[%s1238_s18 + $0x188] sm:$0xff] %v469_v47  ;;  %517 = vst [vmem:[%s1238_s18 + $0x108] sm:$0xff] %v437_v48 }
 0x12d   : > { %v470_v49 = vpop.trf.xlu1  ;;  %v438_v50 = vpop.trf.xlu0 }
 0x12e   : > { %534 = vst [vmem:[%s1238_s18 + $0x190] sm:$0xff] %v470_v49  ;;  %518 = vst [vmem:[%s1238_s18 + $0x110] sm:$0xff] %v438_v50 }
 0x131   : > { %v471_v51 = vpop.trf.xlu1  ;;  %v439_v52 = vpop.trf.xlu0 }
 0x132   : > { %535 = vst [vmem:[%s1238_s18 + $0x198] sm:$0xff] %v471_v51  ;;  %519 = vst [vmem:[%s1238_s18 + $0x118] sm:$0xff] %v439_v52 }
 0x135   : > { %v472_v53 = vpop.trf.xlu1  ;;  %v440_v54 = vpop.trf.xlu0 }
 0x136   : > { %536 = vst [vmem:[%s1238_s18 + $0x1a0] sm:$0xff] %v472_v53  ;;  %520 = vst [vmem:[%s1238_s18 + $0x120] sm:$0xff] %v440_v54 }
 0x139   : > { %v473_v55 = vpop.trf.xlu1  ;;  %v441_v56 = vpop.trf.xlu0 }
 0x13a   : > { %537 = vst [vmem:[%s1238_s18 + $0x1a8] sm:$0xff] %v473_v55  ;;  %521 = vst [vmem:[%s1238_s18 + $0x128] sm:$0xff] %v441_v56 }
 0x13d   : > { %v474_v57 = vpop.trf.xlu1  ;;  %v442_v58 = vpop.trf.xlu0 }
 0x13e   : > { %538 = vst [vmem:[%s1238_s18 + $0x1b0] sm:$0xff] %v474_v57  ;;  %522 = vst [vmem:[%s1238_s18 + $0x130] sm:$0xff] %v442_v58 }
 0x141   : > { %v475_v59 = vpop.trf.xlu1  ;;  %v443_v60 = vpop.trf.xlu0 }
 0x142   : > { %539 = vst [vmem:[%s1238_s18 + $0x1b8] sm:$0xff] %v475_v59  ;;  %523 = vst [vmem:[%s1238_s18 + $0x138] sm:$0xff] %v443_v60 }
 0x145   : > { %v476_v61 = vpop.trf.xlu1  ;;  %v444_v62 = vpop.trf.xlu0 }
 0x146   : > { %540 = vst [vmem:[%s1238_s18 + $0x1c0] sm:$0xff] %v476_v61  ;;  %524 = vst [vmem:[%s1238_s18 + $0x140] sm:$0xff] %v444_v62 }
 0x149   : > { %v477_v63 = vpop.trf.xlu1  ;;  %v445_v0 = vpop.trf.xlu0 }
 0x14a   : > { %541 = vst [vmem:[%s1238_s18 + $0x1c8] sm:$0xff] %v477_v63  ;;  %525 = vst [vmem:[%s1238_s18 + $0x148] sm:$0xff] %v445_v0 }
 0x14d   : > { %v478_v1 = vpop.trf.xlu1  ;;  %v446_v2 = vpop.trf.xlu0 }
 0x14e   : > { %542 = vst [vmem:[%s1238_s18 + $0x1d0] sm:$0xff] %v478_v1  ;;  %526 = vst [vmem:[%s1238_s18 + $0x150] sm:$0xff] %v446_v2 }
 0x151   : > { %v479_v3 = vpop.trf.xlu1  ;;  %v447_v4 = vpop.trf.xlu0 }
 0x152   : > { %543 = vst [vmem:[%s1238_s18 + $0x1d8] sm:$0xff] %v479_v3  ;;  %527 = vst [vmem:[%s1238_s18 + $0x158] sm:$0xff] %v447_v4 }
 0x155   : > { %v480_v5 = vpop.trf.xlu1  ;;  %v448_v6 = vpop.trf.xlu0 }
 0x156   : > { %544 = vst [vmem:[%s1238_s18 + $0x1e0] sm:$0xff] %v480_v5  ;;  %528 = vst [vmem:[%s1238_s18 + $0x160] sm:$0xff] %v448_v6 }
 0x159   : > { %v481_v7 = vpop.trf.xlu1  ;;  %v449_v8 = vpop.trf.xlu0 }
 0x15a   : > { %545 = vst [vmem:[%s1238_s18 + $0x1e8] sm:$0xff] %v481_v7  ;;  %529 = vst [vmem:[%s1238_s18 + $0x168] sm:$0xff] %v449_v8 }
 0x15d   : > { %v482_v13 = vpop.trf.xlu1  ;;  %v450_v14 = vpop.trf.xlu0 }
 0x15e   : > { %546 = vst [vmem:[%s1238_s18 + $0x1f0] sm:$0xff] %v482_v13  ;;  %530 = vst [vmem:[%s1238_s18 + $0x170] sm:$0xff] %v450_v14 }
 0x161   : > { %v483_v15 = vpop.trf.xlu1  ;;  %v451_v16 = vpop.trf.xlu0 }
 0x162   : > { %547 = vst [vmem:[%s1238_s18 + $0x1f8] sm:$0xff] %v483_v15  ;;  %531 = vst [vmem:[%s1238_s18 + $0x178] sm:$0xff] %v451_v16 }
 0x163   : > { %832 = shalt.err (!%p829_p7)
}
 0x164   : > { %s833_s27 = scalar_lea.hbm %s1307_s29, 8192  ;;  %s837_s16 = scalar_lea.hbm %s1362_s2, 16384 }
 0x165   : > { %p834_p13 = scmp.ne.s32.totalorder %s1307_s29, %s833_s27  ;;  %p838_p12 = scmp.lt.u32.totalorder %s1307_s29, %s1362_s2 }
 0x166   : > { %p839_p4 = scmp.lt.u32.totalorder %s837_s16, %s833_s27  ;;  %p841_p5 = scmp.lt.u32.totalorder %s833_s27, %s1307_s29 }
 0x167   : > { %p835_p2 = pnand %p834_p13, %p1383_p10 }
 0x168   : > { %p840_p8 = por %p839_p4, %p838_p12 }
 0x169   : > { %p836_p6 = pneg %p835_p2 }
 0x16a   : > { %p842_p11 = por %p841_p5, %p840_p8 }
 0x16c   : > { %p843_p1 = pnand %p842_p11, %p836_p6 }
 0x16e   : > { %846 = shalt.err (!%p843_p1)
}
 0x16f   : > { %s912_s26 = smov 128   ;;  %s913_s18 = smov 256  }
 0x170   : > { %s914_s20 = smov 8  }
 0x171   : > { %689 = dma.vmem_to_hbm [thread:$0]  (%p1383_p10), %s1309_s23, 8192, %s1307_s29, %s549_s12, %s912_s26, %s913_s18, %s914_s20  }
 0x172 PF: > { %s579_s7 = sand.u32 1, %s885_s9   ;;  %p1384_p0 = scmp.ne.s32.totalorder %s1373_s22, 0 }
 0x173   : > { %p1385_p9 = scmp.ge.s32.totalorder %s905_s14, 2  ;;  %s580_s15 = scalar_lea.sflag [#allocation4], %s579_s7 }
 0x175   : > { %p700_p3 = pnand %p1385_p9, %p1384_p0 }
 0x177   : > { %880 = dma.done.wait (!%p700_p3), %s580_s15, 8192  }
 0x178   : > { %882 = vsyncadd (!%p700_p3), %s580_s15, 4294959104  ;;  %s19_s14 = sadd.s32 1, %s905_s14   ;;  %s1386_s9 = smov %s889_s10 }
 0x179   : > { %p16_p7 = scmp.ge.s32.totalorder %s19_s14, 4   ;;  %s1387_s10 = smov %s893_s11 }
 0x17a   : > { %s1388_s11 = smov %s1049_s25  ;;  %s1389_s12 = smov %s901_s13 }
 0x17b   : > { %s1390_s13 = smov %s1392_s28  ;;  %18 = sbr.rel (!%p16_p7) target bundleno = 7 (0x7), region = 79 }
 0x182   :  { %585 = vsyncpa [#allocation3], 1 }
 0x183   :  { %587 = vsyncpa [#allocation3 + $0x1], 1 }
 0x184   :  { %588 = vsyncpa [#allocation6], 1 }
 0x185   :  { %590 = vsyncpa [#allocation6 + $0x1], 1 }
 0x186   :  { %591 = vsyncpa [#allocation4], 1 }
 0x187   :  { %593 = vsyncpa [#allocation4 + $0x1], 1 }

</bundles_post_ra>
